<compile_context>
chip_gen: v7x
topology: tpu7x:2x2x1
jax: 0.10.0
libtpu: 0.0.40
codegen_flags: <defaults>
</compile_context>

<pallas_src>
import jax
import jax.numpy as jnp
from jax.experimental import pallas as pl
from jax.experimental.pallas import tpu as pltpu

_LANE = 128
_SUBLANE_F32 = 8
_SUBLANE_BF16 = 16
# Double-buffered activation/output traffic budget; fits the smallest default
# scoped-VMEM limit (16 MiB on v5e) with room for weights + bookkeeping.
_VMEM_IO_BUDGET = 12 * 1024 * 1024


def _round_up(x, m):
    return ((x + m - 1) // m) * m


def _mlp_kernel(x_ref, w0_ref, b0_ref, w1_ref, b1_ref, wo_ref, bo_ref, out_ref):
    """mean_net forward for one batch tile: 2 x (Linear + tanh) + identity head."""
    w_dt = w1_ref.dtype  # compute dtype of the weights (fp32 or bf16)
    h = jnp.tanh(
        jnp.dot(x_ref[...], w0_ref[...], preferred_element_type=jnp.float32)
        + b0_ref[...]
    ).astype(w_dt)
    h = jnp.tanh(
        jnp.dot(h, w1_ref[...], preferred_element_type=jnp.float32)
        + b1_ref[...]
    ).astype(w_dt)
    out_ref[...] = (
        jnp.dot(h, wo_ref[...], preferred_element_type=jnp.float32)
        + bo_ref[...]
    ).astype(out_ref.dtype)


def concat_mlp_forward(inputs, params, *, max_batch_tile=4096,
                       lane_pad_output=None, use_bf16=False):
    """ConcatMLP.forward: concat along dim=1 + mean_net MLP as one Pallas kernel.

    Returns (batch_mean [B, ac_dim], std [ac_dim]) -- the parameters of
    MultivariateNormal(batch_mean, scale_tril=diag(std)).
    """
    obs, act = (jnp.asarray(a, jnp.float32) for a in inputs)
    # Concat once in the wrapper (dim=1). Cost is ~in_dim*4 bytes/row of extra
    # HBM traffic -- trivial -- and it removes one double-buffered input ref
    # and halves first-layer MXU pushes vs. the split obs@w0a + act@w0b form.
    x = jnp.concatenate([obs, act], axis=1)
    B, in_dim = x.shape
    size = params["w1"].shape[0]
    ac_dim = params["wo"].shape[1]

    compute_dtype = jnp.bfloat16 if use_bf16 else jnp.float32
    sublane = _SUBLANE_BF16 if use_bf16 else _SUBLANE_F32
    itemsize = jnp.dtype(compute_dtype).itemsize

    # Output lane padding: lane-dense (unmasked vst) stores for small batches;
    # for large batches emit (B, ac_dim) directly so HBM writes are not
    # inflated 32x (matters most on v5e's ~0.82 TB/s).
    if lane_pad_output is None:
        lane_pad_output = B <= 2048
    n_out = _round_up(ac_dim, _LANE) if lane_pad_output else ac_dim

    # --- parameter prep (static; happens once per call) --------------------
    w0, w1, wo = params["w0"], params["w1"], params["wo"]
    b0, b1, bo = params["b0"], params["b1"], params["bo"]
    if n_out != ac_dim:
        wo = jnp.pad(wo, ((0, 0), (0, n_out - ac_dim)))
        bo = jnp.pad(bo, ((0, 0), (0, n_out - ac_dim)))
    if use_bf16:
        x = x.astype(compute_dtype)
        w0 = w0.astype(compute_dtype)
        w1 = w1.astype(compute_dtype)
        wo = wo.astype(compute_dtype)
        # Biases stay fp32: they are added to the fp32 MXU accumulator.

    # --- batch tile selection ----------------------------------------------
    # Big tiles: this kernel is per-grid-step-overhead bound, so fewer/bigger
    # steps is the main lever. Tile is always a multiple of the sublane count.
    tb = _round_up(max(sublane, min(B, max_batch_tile)), sublane)
    per_row = 2 * (in_dim * itemsize + n_out * 4)          # double-buffered in+out
    max_rows = max(sublane, (_VMEM_IO_BUDGET // per_row) // sublane * sublane)
    tb = min(tb, max_rows)
    # v7x megacore: for big batches make sure the ("parallel",) axis has at
    # least 2 grid steps so both TensorCores get work (no-op on v5e/v6e).
    if B >= 2048 and pl.cdiv(B, tb) < 2:
        tb = _round_up(pl.cdiv(B, 2), sublane)
    grid = (pl.cdiv(B, tb),)   # ragged tail handled by Pallas masked writeback

    def resident(a):
        # Constant index_map -> block stays VMEM-resident across grid steps.
        return pl.BlockSpec(a.shape, lambda i: (0, 0))

    flops = 2 * B * (in_dim * size + size * size + size * n_out)
    bytes_accessed = (B * in_dim * itemsize + B * n_out * 4
                      + (in_dim * size + size * size + size * n_out) * itemsize
                      + (2 * size + n_out) * 4)
    cost = pl.CostEstimate(flops=flops,
                           transcendentals=2 * B * size,       # tanh x 2 layers
                           bytes_accessed=bytes_accessed)

    out = pl.pallas_call(
        _mlp_kernel,
        grid=grid,
        out_shape=jax.ShapeDtypeStruct((B, n_out), jnp.float32),
        in_specs=[
            pl.BlockSpec((tb, in_dim), lambda i: (i, 0)),      # batch-tiled input
            resident(w0), resident(b0),
            resident(w1), resident(b1),
            resident(wo), resident(bo),
        ],
        out_specs=pl.BlockSpec((tb, n_out), lambda i: (i, 0)),
        compiler_params=pltpu.CompilerParams(
            dimension_semantics=("parallel",),
            vmem_limit_bytes=32 * 1024 * 1024),
        cost_estimate=cost,
    )(x, w0, b0, w1, b1, wo, bo)

    batch_mean = out[:, :ac_dim] if n_out != ac_dim else out

    # std = exp(logstd): ac_dim elements, stays out of the kernel entirely.
    std = jnp.exp(params["logstd"][0])

    # TODO(synk): torch.distributions.MultivariateNormal has no JAX/Pallas
    # equivalent; we return its parameters (batch_mean, std). Consumers should
    # build diag(std) lazily instead of materializing (B, ac_dim, ac_dim).
    return batch_mean, std


def init_params(key, ob_dim, ac_dim, n_layers, size):
    """Deterministic synthetic init matching mean_net shapes (+ logstd = zeros)."""
    assert n_layers == 2, "this script instantiates the n_layers=2 configuration"
    k0, k1, k2 = jax.random.split(key, 3)
    s = 0.1
    return {
        "w0": s * jax.random.normal(k0, (ob_dim, size), jnp.float32),
        "b0": jnp.zeros((1, size), jnp.float32),
        "w1": s * jax.random.normal(k1, (size, size), jnp.float32),
        "b1": jnp.zeros((1, size), jnp.float32),
        "wo": s * jax.random.normal(k2, (size, ac_dim), jnp.float32),
        "bo": jnp.zeros((1, ac_dim), jnp.float32),
        "logstd": jnp.zeros((1, ac_dim), jnp.float32),  # nn.Parameter(zeros(ac_dim))
    }


if __name__ == "__main__":
    # ConcatMLP config: ob_dim equals the concatenated feature width.
    obs_dim, act_in_dim = 10, 6            # two inputs concatenated along dim=1
    ob_dim = obs_dim + act_in_dim          # 16
    ac_dim, n_layers, size = 4, 2, 32

    root = jax.random.PRNGKey(0)
    k_param, _ = jax.random.split(root)
    params = init_params(k_param, ob_dim, ac_dim, n_layers, size)

    def reference_mean(obs, act):
        xx = jnp.concatenate([obs, act], axis=1)
        h = jnp.tanh(xx @ params["w0"] + params["b0"])
        h = jnp.tanh(h @ params["w1"] + params["b1"])
        return h @ params["wo"] + params["bo"]

    # fp32 cases (exact-ish check):
    #   1. tiny batch, single (padded) grid step, lane-padded output
    #   2. ragged batch + small tile -> multi-step grid, masked tail writeback
    #   3. narrow (ac_dim-wide) output path
    cases = [
        dict(B=2),
        dict(B=20, max_batch_tile=8),
        dict(B=20, lane_pad_output=False),
    ]
    for cfg in cases:
        B = cfg.pop("B")
        k_o, k_a = jax.random.split(jax.random.PRNGKey(B))
        obs = jax.random.normal(k_o, (B, obs_dim), jnp.float32)
        act = jax.random.normal(k_a, (B, act_in_dim), jnp.float32)

        mean, std = concat_mlp_forward((obs, act), params, **cfg)
        jax.block_until_ready((mean, std))

        assert mean.shape == (B, ac_dim)
        assert std.shape == (ac_dim,)
        assert jnp.allclose(mean, reference_mean(obs, act), atol=1e-5, rtol=1e-5)
        assert jnp.allclose(std, jnp.exp(params["logstd"][0]))

    # bf16 data path (halves DMA bytes on v6e/v7x); looser tolerance.
    B = 64
    k_o, k_a = jax.random.split(jax.random.PRNGKey(B))
    obs = jax.random.normal(k_o, (B, obs_dim), jnp.float32)
    act = jax.random.normal(k_a, (B, act_in_dim), jnp.float32)
    mean_bf16, std_bf16 = concat_mlp_forward((obs, act), params, use_bf16=True)
    jax.block_until_ready((mean_bf16, std_bf16))
    assert mean_bf16.shape == (B, ac_dim)
    assert jnp.allclose(mean_bf16, reference_mean(obs, act), atol=5e-2, rtol=5e-2)

    print("KERNEL_OK")
</pallas_src>

<mosaic_0001>
module attributes {stable_mosaic.version = 11 : i64} {
  func.func @_mlp_kernel(%arg0: i32, %arg1: memref<8x16xf32, #tpu.memory_space<vmem>>, %arg2: memref<16x32xf32, #tpu.memory_space<vmem>>, %arg3: memref<1x32xf32, #tpu.memory_space<vmem>>, %arg4: memref<32x32xf32, #tpu.memory_space<vmem>>, %arg5: memref<1x32xf32, #tpu.memory_space<vmem>>, %arg6: memref<32x128xf32, #tpu.memory_space<vmem>>, %arg7: memref<1x128xf32, #tpu.memory_space<vmem>>, %arg8: memref<8x128xf32, #tpu.memory_space<vmem>>) attributes {dimension_semantics = [#tpu.dimension_semantics<parallel>], iteration_bounds = array<i64: 1>, scalar_prefetch = 0 : i64, scratch_operands = 0 : i64, tpu.core_type = #tpu.core_type<tc>, window_params = [{transform_indices = @transform_0, window_bounds = array<i64: 8, 16>}, {pipeline_mode = #tpu.pipeline_mode<synchronous>, transform_indices = @transform_1, window_bounds = array<i64: 16, 32>}, {pipeline_mode = #tpu.pipeline_mode<synchronous>, transform_indices = @transform_2, window_bounds = array<i64: 1, 32>}, {pipeline_mode = #tpu.pipeline_mode<synchronous>, transform_indices = @transform_3, window_bounds = array<i64: 32, 32>}, {pipeline_mode = #tpu.pipeline_mode<synchronous>, transform_indices = @transform_4, window_bounds = array<i64: 1, 32>}, {pipeline_mode = #tpu.pipeline_mode<synchronous>, transform_indices = @transform_5, window_bounds = array<i64: 32, 128>}, {pipeline_mode = #tpu.pipeline_mode<synchronous>, transform_indices = @transform_6, window_bounds = array<i64: 1, 128>}, {transform_indices = @transform_7, window_bounds = array<i64: 8, 128>}]} {
    %c0 = arith.constant 0 : index
    %c0_0 = arith.constant 0 : index
    %0 = vector.load %arg1[%c0, %c0_0] : memref<8x16xf32, #tpu.memory_space<vmem>>, vector<8x16xf32>
    %c0_1 = arith.constant 0 : index
    %c0_2 = arith.constant 0 : index
    %1 = vector.load %arg2[%c0_1, %c0_2] : memref<16x32xf32, #tpu.memory_space<vmem>>, vector<16x32xf32>
    %cst = arith.constant dense<0.000000e+00> : vector<8x32xf32>
    %2 = tpu.matmul %0, %1, %cst {dimension_numbers = #tpu.dot_dimension_numbers<[1], [0], [0], [1], [0, 0, 1, 1], [], []>} : vector<8x16xf32>, vector<16x32xf32>, vector<8x32xf32> -> vector<8x32xf32>
    %c0_3 = arith.constant 0 : index
    %c0_4 = arith.constant 0 : index
    %3 = vector.load %arg3[%c0_3, %c0_4] : memref<1x32xf32, #tpu.memory_space<vmem>>, vector<1x32xf32>
    %4 = vector.broadcast %3 : vector<1x32xf32> to vector<8x32xf32>
    %5 = arith.addf %2, %4 : vector<8x32xf32>
    %6 = math.tanh %5 : vector<8x32xf32>
    %c0_5 = arith.constant 0 : index
    %c0_6 = arith.constant 0 : index
    %7 = vector.load %arg4[%c0_5, %c0_6] : memref<32x32xf32, #tpu.memory_space<vmem>>, vector<32x32xf32>
    %cst_7 = arith.constant dense<0.000000e+00> : vector<8x32xf32>
    %8 = tpu.matmul %6, %7, %cst_7 {dimension_numbers = #tpu.dot_dimension_numbers<[1], [0], [0], [1], [0, 0, 1, 1], [], []>} : vector<8x32xf32>, vector<32x32xf32>, vector<8x32xf32> -> vector<8x32xf32>
    %c0_8 = arith.constant 0 : index
    %c0_9 = arith.constant 0 : index
    %9 = vector.load %arg5[%c0_8, %c0_9] : memref<1x32xf32, #tpu.memory_space<vmem>>, vector<1x32xf32>
    %10 = vector.broadcast %9 : vector<1x32xf32> to vector<8x32xf32>
    %11 = arith.addf %8, %10 : vector<8x32xf32>
    %12 = math.tanh %11 : vector<8x32xf32>
    %c0_10 = arith.constant 0 : index
    %c0_11 = arith.constant 0 : index
    %13 = vector.load %arg6[%c0_10, %c0_11] : memref<32x128xf32, #tpu.memory_space<vmem>>, vector<32x128xf32>
    %cst_12 = arith.constant dense<0.000000e+00> : vector<8x128xf32>
    %14 = tpu.matmul %12, %13, %cst_12 {dimension_numbers = #tpu.dot_dimension_numbers<[1], [0], [0], [1], [0, 0, 1, 1], [], []>} : vector<8x32xf32>, vector<32x128xf32>, vector<8x128xf32> -> vector<8x128xf32>
    %c0_13 = arith.constant 0 : index
    %c0_14 = arith.constant 0 : index
    %15 = vector.load %arg7[%c0_13, %c0_14] : memref<1x128xf32, #tpu.memory_space<vmem>>, vector<1x128xf32>
    %16 = vector.broadcast %15 : vector<1x128xf32> to vector<8x128xf32>
    %17 = arith.addf %14, %16 : vector<8x128xf32>
    %c0_15 = arith.constant 0 : index
    %c0_16 = arith.constant 0 : index
    %18 = vector.load %arg8[%c0_15, %c0_16] : memref<8x128xf32, #tpu.memory_space<vmem>>, vector<8x128xf32>
    tpu.vector_store %arg8[%c0_15, %c0_16], %17 {strides = array<i32>} : memref<8x128xf32, #tpu.memory_space<vmem>>, vector<8x128xf32>,
    return
  }
  func.func @transform_0(%arg0: i32) -> (i32, i32) {
    %c0_i32 = arith.constant 0 : i32
    %c0_i32_0 = arith.constant 0 : i32
    return %arg0, %c0_i32 : i32, i32
  }
  func.func @transform_1(%arg0: i32) -> (i32, i32) {
    %c0_i32 = arith.constant 0 : i32
    %c0_i32_0 = arith.constant 0 : i32
    %c0_i32_1 = arith.constant 0 : i32
    return %c0_i32, %c0_i32_0 : i32, i32
  }
  func.func @transform_2(%arg0: i32) -> (i32, i32) {
    %c0_i32 = arith.constant 0 : i32
    %c0_i32_0 = arith.constant 0 : i32
    %c0_i32_1 = arith.constant 0 : i32
    return %c0_i32, %c0_i32_0 : i32, i32
  }
  func.func @transform_3(%arg0: i32) -> (i32, i32) {
    %c0_i32 = arith.constant 0 : i32
    %c0_i32_0 = arith.constant 0 : i32
    %c0_i32_1 = arith.constant 0 : i32
    return %c0_i32, %c0_i32_0 : i32, i32
  }
  func.func @transform_4(%arg0: i32) -> (i32, i32) {
    %c0_i32 = arith.constant 0 : i32
    %c0_i32_0 = arith.constant 0 : i32
    %c0_i32_1 = arith.constant 0 : i32
    return %c0_i32, %c0_i32_0 : i32, i32
  }
  func.func @transform_5(%arg0: i32) -> (i32, i32) {
    %c0_i32 = arith.constant 0 : i32
    %c0_i32_0 = arith.constant 0 : i32
    %c0_i32_1 = arith.constant 0 : i32
    return %c0_i32, %c0_i32_0 : i32, i32
  }
  func.func @transform_6(%arg0: i32) -> (i32, i32) {
    %c0_i32 = arith.constant 0 : i32
    %c0_i32_0 = arith.constant 0 : i32
    %c0_i32_1 = arith.constant 0 : i32
    return %c0_i32, %c0_i32_0 : i32, i32
  }
  func.func @transform_7(%arg0: i32) -> (i32, i32) {
    %c0_i32 = arith.constant 0 : i32
    %c0_i32_0 = arith.constant 0 : i32
    return %arg0, %c0_i32 : i32, i32
  }
}

</mosaic_0001>

<bundles_post_ra>
// kernel: tpu_custom_call.1
= control target key start
LH: loop header
LB: loop body
LE: loop exit
PB: predicated region body
PF: predicated region fallthrough
CT: control target
= control target key end

     0   :  { %12 = vsyncpa [#allocation3], 0  ;;  %s699_s0 = inlined_call_operand.hbm [shape: f32[2,16], index: 0, kind: input, shape index: {}]   ;;  %s700_s1 = inlined_call_operand.hbm [shape: f32[16,32], index: 1, kind: input, shape index: {}]   ;;  %s701_s2 = inlined_call_operand.vmem [shape: f32[1,32], index: 2, kind: input, shape index: {}]   ;;  %s702_s3 = inlined_call_operand.hbm [shape: f32[32,32], index: 3, kind: input, shape index: {}]   ;;  %s703_s4 = inlined_call_operand.vmem [shape: f32[1,32], index: 4, kind: input, shape index: {}]   ;;  %s704_s5 = inlined_call_operand.hbm [shape: f32[32,128], index: 5, kind: input, shape index: {}]   ;;  %s705_s6 = inlined_call_operand.vmem [shape: f32[1,128], index: 6, kind: input, shape index: {}]   ;;  %s706_s7 = inlined_call_operand.hbm [shape: f32[2,128], index: 7, kind: output, shape index: {}]  }
   0x1   :  { %13 = vsyncpa [#allocation6], 0 }
   0x2   :  { %14 = vsyncpa [#allocation9], 0 }
   0x3   :  { %15 = vsyncpa [#allocation4], 0 }
   0x4   :  { %20 = vsyncadd [#allocation3], 96  ;;  %s554_s24 = smov [#allocation5]   ;;  %s436_s28 = scalar_lea.hbm %s700_s1, 256 }
   0x5   :  { %s33_s25 = sshll.u32 %s554_s24, 4  ;;  %p437_p0 = scmp.ne.s32.totalorder %s700_s1, %s436_s28  ;;  %s34_s25 = int_to_ptr.vmem [resolvable:$true] %s33_s25 }
   0x6   :  { %p440_p1 = scmp.lt.u32.totalorder %s436_s28, %s700_s1 }
   0x8   :  { %p442_p2 = pnand %p440_p1, %p437_p0 }
   0xa   :  { %445 = shalt.err (!%p442_p2)
}
   0xb   :  { %s446_s10 = scalar_lea.vmem %s34_s25, 256  ;;  %p451_p4 = scmp.lt.s32.totalorder %s34_s25, %s34_s25 }
   0xc   :  { %p447_p3 = scmp.ne.s32.totalorder %s34_s25, %s446_s10  ;;  %p452_p5 = scmp.lt.s32.totalorder %s446_s10, %s446_s10 }
   0xe   :  { %p453_p6 = por %p452_p5, %p451_p4 }
  0x10   :  { %p454_p7 = pnand %p453_p6, %p447_p3 }
  0x12   :  { %457 = shalt.err (!%p454_p7)
}
  0x13   :  { %s555_s11 = smov 128   ;;  %s556_s12 = smov 8  }
  0x14   :  { %39 = dma.hbm_to_vmem [thread:$0]  %s700_s1, 256, %s34_s25, [#allocation6], %s555_s11, %s555_s11, %s556_s12  }
  0x15   :  { %s557_s15 = smov [#allocation2]   ;;  %s458_s19 = scalar_lea.hbm %s699_s0, 32 }
  0x16   :  { %s21_s16 = sshll.u32 %s557_s15, 4  ;;  %p459_p8 = scmp.ne.s32.totalorder %s699_s0, %s458_s19  ;;  %s22_s16 = int_to_ptr.vmem [resolvable:$true] %s21_s16 }
  0x17   :  { %p462_p9 = scmp.lt.u32.totalorder %s458_s19, %s699_s0 }
  0x19   :  { %p464_p10 = pnand %p462_p9, %p459_p8 }
  0x1b   :  { %467 = shalt.err (!%p464_p10)
}
  0x1c   :  { %s468_s24 = scalar_lea.vmem %s22_s16, 32  ;;  %s472_s1 = scalar_lea.vmem %s22_s16, 128 }
  0x1d   :  { %p469_p11 = scmp.ne.s32.totalorder %s22_s16, %s468_s24  ;;  %p473_p12 = scmp.lt.s32.totalorder %s22_s16, %s22_s16 }
  0x1e   :  { %p474_p13 = scmp.lt.s32.totalorder %s472_s1, %s468_s24 }
  0x20   :  { %p475_p0 = por %p474_p13, %p473_p12 }
  0x22   :  { %p476_p1 = pnand %p475_p0, %p469_p11 }
  0x24   :  { %479 = shalt.err (!%p476_p1)
}
  0x25   :  { %s558_s25 = smov 32   ;;  %s559_s26 = smov 2  }
  0x26   :  { %27 = dma.hbm_to_vmem [thread:$0]  %s699_s0, 32, %s22_s16, [#allocation3], %s558_s25, %s558_s25, %s559_s26  }
  0x27   :  { %s560_s29 = smov [#allocation7]   ;;  %s561_s8 = smov [#allocation8]  }
  0x28   :  { %s47_s30 = sshll.u32 %s560_s29, 4  ;;  %s61_s9 = sshll.u32 %s561_s8, 4  ;;  %s48_s30 = int_to_ptr.vmem [resolvable:$true] %s47_s30  ;;  %s636_s9 = int_to_ptr.vmem [resolvable:$true] %s61_s9 }
  0x29   :  { %s480_s14 = scalar_lea.hbm %s702_s3, 512 }
  0x2a   :  { %p481_p2 = scmp.ne.s32.totalorder %s702_s3, %s480_s14  ;;  %p484_p3 = scmp.lt.u32.totalorder %s480_s14, %s702_s3 }
  0x2c   :  { %p486_p4 = pnand %p484_p3, %p481_p2 }
  0x2e   :  { %489 = shalt.err (!%p486_p4)
}
  0x2f   :  { %s490_s0 = scalar_lea.vmem %s48_s30, 512  ;;  %p495_p6 = scmp.lt.s32.totalorder %s48_s30, %s48_s30 }
  0x30   :  { %p491_p5 = scmp.ne.s32.totalorder %s48_s30, %s490_s0  ;;  %p496_p7 = scmp.lt.s32.totalorder %s490_s0, %s490_s0 }
  0x32   :  { %p497_p8 = por %p496_p7, %p495_p6 }
  0x34   :  { %p498_p9 = pnand %p497_p8, %p491_p5 }
  0x36   :  { %501 = shalt.err (!%p498_p9)
}
  0x37   :  { %53 = dma.hbm_to_vmem [thread:$0]  %s702_s3, 512, %s48_s30, [#allocation6], %s555_s11, %s555_s11, %s556_s12  }
  0x38   :  { %s502_s23 = scalar_lea.hbm %s704_s5, 512 }
  0x39   :  { %p503_p10 = scmp.ne.s32.totalorder %s704_s5, %s502_s23  ;;  %p506_p11 = scmp.lt.u32.totalorder %s502_s23, %s704_s5 }
  0x3b   :  { %p508_p12 = pnand %p506_p11, %p503_p10 }
  0x3d   :  { %511 = shalt.err (!%p508_p12)
}
  0x3e   :  { %s512_s29 = scalar_lea.vmem %s636_s9, 512  ;;  %p517_p0 = scmp.lt.s32.totalorder %s636_s9, %s636_s9 }
  0x3f   :  { %p513_p13 = scmp.ne.s32.totalorder %s636_s9, %s512_s29  ;;  %p518_p1 = scmp.lt.s32.totalorder %s512_s29, %s512_s29 }
  0x41   :  { %p519_p2 = por %p518_p1, %p517_p0 }
  0x43   :  { %p520_p3 = pnand %p519_p2, %p513_p13 }
  0x45   :  { %523 = shalt.err (!%p520_p3)
}
  0x46   :  { %67 = dma.hbm_to_vmem [thread:$0]  %s704_s5, 512, %s636_s9, [#allocation9], %s555_s11, %s555_s11, %s556_s12  }
  0x47   :  { %546 = dma.done.wait [#allocation3], 128  }
  0x48   :  { %547 = vsyncadd [#allocation3], 4294967168 }
  0x49   :  { %548 = dma.done.wait [#allocation6], 768  }
  0x4a   :  { %549 = vsyncadd [#allocation6], 4294966528 }
  0x4b   :  { %550 = dma.done.wait [#allocation9], 512  }
  0x4c   :  { %551 = vsyncadd [#allocation9], 4294966784  ;;  %v562_v0 = vmov 0.0|0.0   ;;  %vm563_vm0 = vmmov 0   ;;  %v564_v1 = vmov 0.0   ;;  %v83_v2 = vld [vmem:[#allocation5] sm:$0xff] }
  0x4d   :  { %405 = vmatprep.subr.bf16.mxu0 %v562_v0  ;;  %380 = vmatprep.mubr.msk.f32.mxu0 %vm563_vm0, %v564_v1  ;;  %v84_v3 = vld [vmem:[#allocation5 + $0x8] sm:$0xff]  ;;  %v82_v5 = vld [vmem:[#allocation2] sm:$0xff]  ;;  %vm92_vm1 = vcmask 130048   ;;  %v167_v6 = vld [vmem:[#allocation7] sm:$0xff]  ;;  %vm178_vm2 = vcmask 261120  }
  0x4e   :  { %408 = vmatprep.subr.bf16.mxu1 %v562_v0  ;;  %391 = vmatprep.mubr.msk.f32.mxu1 %vm563_vm0, %v564_v1  ;;  %v406_v4 = vpack.c.bf16 %v84_v3, %v83_v2  ;;  %v168_v7 = vld [vmem:[#allocation7 + $0x8] sm:$0xff]  ;;  %v169_v8 = vld [vmem:[#allocation7 + $0x10] sm:$0xff]  ;;  %v170_v10 = vld [vmem:[#allocation7 + $0x18] sm:$0xff] }
  0x4f   :  { %v409_v9 = vpack.c.bf16 %v168_v7, %v167_v6  ;;  %v412_v11 = vpack.c.bf16 %v170_v10, %v169_v8  ;;  %v357_v12 = vld [vmem:[%s701_s2] ss:$0 sm:$0xff]  ;;  %v253_v17 = vld [vmem:[#allocation8] sm:$0xff]  ;;  %v255_v19 = vld [vmem:[#allocation8 + $0x10] sm:$0xff] }
  0x50   :  { %407 = vmatpush3.bf16.msra.mxu0 %v406_v4  ;;  %v254_v18 = vld [vmem:[#allocation8 + $0x8] sm:$0xff]  ;;  %v256_v21 = vld [vmem:[#allocation8 + $0x18] sm:$0xff] }
  0x51   :  { %414 = vmatprep.subr.bf16.mxu0 %v562_v0  ;;  %410 = vmatpush3.bf16.msra.mxu1 %v409_v9  ;;  %v415_v20 = vpack.c.bf16 %v254_v18, %v253_v17  ;;  %v418_v22 = vpack.c.bf16 %v256_v21, %v255_v19  ;;  %v359_v23 = vld [vmem:[%s703_s4] ss:$0 sm:$0xff] }
  0x52   :  { %411 = vmatprep.subr.bf16.mxu1 %v562_v0  ;;  %v361_v28 = vld [vmem:[%s705_s6] ss:$0 sm:$0xff] }
  0x53   :  { %381 = vmatmul.mubr.msk.f32.vlgmr.msra.gmra.mrb[0].mxu0 %vm92_vm1, %v82_v5 }
  0x54   :  { %402 = vmatprep.mubr.msk.f32.mxu0 %vm563_vm0, %v564_v1  ;;  %416 = vmatpush3.bf16.msra.mxu0 %v415_v20 }
  0x55   :  { %413 = vmatpush3.bf16.msra.mxu1 %v412_v11  ;;  %417 = vmatprep.subr.bf16.mxu0 %v562_v0 }
  0x58   :  { %419 = vmatpush3.bf16.msra.mxu0 %v418_v22 }
 0x126   :  { %v162_v13 = vpop.f32.mrb[0].mxu0 }
 0x127   :  { %v163_v14 = vadd.f32 %v357_v12, %v162_v13  ;;  %v382_v15 = vpop.f32.mrb[1].mxu0 }
 0x129   :  { %432 = vtanh.f32 %v163_v14 }
 0x133   :  { %v433_v16 = vpop.eup %432 }
 0x134   :  { %392 = vmatmul.mubr.msk.f32.vlgmr.msra.gmra.mrb[0].mxu1 %vm178_vm2, %v433_v16 }
 0x207   :  { %v248_v24 = vpop.f32.mrb[0].mxu1 }
 0x208   :  { %v249_v25 = vadd.f32 %v359_v23, %v248_v24  ;;  %v393_v26 = vpop.f32.mrb[1].mxu1 }
 0x20a   :  { %434 = vtanh.f32 %v249_v25 }
 0x214   :  { %v435_v27 = vpop.eup %434 }
 0x215   :  { %403 = vmatmul.mubr.msk.f32.vlgmr.msra.gmra.mrb[2].mxu0 %vm178_vm2, %v435_v27 }
 0x2e8   :  { %v333_v29 = vpop.f32.mrb[2].mxu0 }
 0x2e9   :  { %v334_v30 = vadd.f32 %v361_v28, %v333_v29  ;;  %v404_v31 = vpop.f32.mrb[3].mxu0 }
 0x2eb   :  { %337 = vst [vmem:[#allocation10] sm:$0xff] %v334_v30 }
 0x2ec   :  { %342 = vsyncadd [#allocation4], 96  ;;  %s565_s10 = smov [#allocation10]  }
 0x2ed   :  { %s343_s13 = sshll.u32 %s565_s10, 4  ;;  %s344_s13 = int_to_ptr.vmem [resolvable:$true] %s343_s13 }
 0x2ee   :  { %s524_s4 = scalar_lea.vmem %s344_s13, 32  ;;  %s528_s14 = scalar_lea.vmem %s344_s13, 128 }
 0x2ef   :  { %p525_p4 = scmp.ne.s32.totalorder %s344_s13, %s524_s4  ;;  %p529_p5 = scmp.lt.s32.totalorder %s344_s13, %s344_s13 }
 0x2f0   :  { %p530_p6 = scmp.lt.s32.totalorder %s528_s14, %s524_s4 }
 0x2f2   :  { %p531_p7 = por %p530_p6, %p529_p5 }
 0x2f4   :  { %p532_p8 = pnand %p531_p7, %p525_p4 }
 0x2f6   :  { %535 = shalt.err (!%p532_p8)
}
 0x2f7   :  { %s536_s6 = scalar_lea.hbm %s706_s7, 32 }
 0x2f8   :  { %p537_p9 = scmp.ne.s32.totalorder %s706_s7, %s536_s6  ;;  %p540_p10 = scmp.lt.u32.totalorder %s536_s6, %s706_s7 }
 0x2fa   :  { %p542_p11 = pnand %p540_p10, %p537_p9 }
 0x2fc   :  { %545 = shalt.err (!%p542_p11)
}
 0x2fd   :  { %349 = dma.vmem_to_hbm [thread:$0]  %s344_s13, 32, %s706_s7, [#allocation4], %s558_s25, %s558_s25, %s559_s26  }
 0x2fe   :  { %552 = dma.done.wait [#allocation4], 128  }
 0x2ff   :  { %553 = vsyncadd [#allocation4], 4294967168 }
 0x300   :  { %353 = vsyncpa [#allocation3], 1 }
 0x301   :  { %354 = vsyncpa [#allocation6], 1 }
 0x302   :  { %355 = vsyncpa [#allocation9], 1 }
 0x303   :  { %356 = vsyncpa [#allocation4], 1 }

</bundles_post_ra>
